<compile_context>
chip_gen: v7x
topology: tpu7x:2x2x1
jax: 0.10.0
libtpu: 0.0.40
codegen_flags: <defaults>
</compile_context>

<pallas_src>
import jax
import jax.numpy as jnp
from jax.experimental import pallas as pl
from jax.experimental.pallas import tpu as pltpu

_MIB = 1024 * 1024


# ---------------------------------------------------------------------------
# Kernels
# ---------------------------------------------------------------------------

def _value_head_kernel(h_ref, w_ref, b_ref, o_ref):
    """n_output == 1 head with a lane-dense output row.

    h_ref: (TB, n_input) VMEM
    w_ref: (1, n_input)  VMEM  (PyTorch nn.Linear row, resident)
    b_ref: (1,)          SMEM  scalar bias
    o_ref: (1, TB)       VMEM  lane-dense output row
    """
    # W @ h^T: contracting the last dims of both operands is the standard
    # A.B^T MXU pattern; it yields the (1, TB) row directly (no column->row
    # relayout) and accumulates in f32.
    acc = jax.lax.dot_general(
        w_ref[...], h_ref[...],
        dimension_numbers=(((1,), (1,)), ((), ())),
        preferred_element_type=jnp.float32)               # (1, TB)
    o_ref[...] = (acc + b_ref[0]).astype(o_ref.dtype)


def _linear_kernel(h_ref, wt_ref, b_ref, o_ref):
    """General n_output path: h @ W^T with W pre-transposed in the wrapper.

    h_ref:  (TB, n_input)        VMEM
    wt_ref: (n_input, n_output)  VMEM (transposed once, resident)
    b_ref:  (1, n_output)        VMEM
    o_ref:  (TB, n_output)       VMEM
    """
    acc = jnp.dot(h_ref[...], wt_ref[...], preferred_element_type=jnp.float32)
    o_ref[...] = (acc + b_ref[...]).astype(o_ref.dtype)


# ---------------------------------------------------------------------------
# Tiling / VMEM-budget helpers
# ---------------------------------------------------------------------------

def _vmem_capacity_bytes():
    try:
        return int(pltpu.get_tpu_info().vmem_capacity_bytes)
    except Exception:
        return 64 * _MIB          # conservative: v7x per-TensorCore VMEM


def _round_down(x, m):
    return (x // m) * m


def _choose_tile_rows(batch, n_input, itemsize, vmem_cap):
    """Rows per h tile: ~4 MiB of h per tile (HBM-roofline plateau), a
    multiple of 128 (lane-dense output blocks), a ~1 MiB floor (0.35 us/step
    grid overhead), and small enough that >= 4 grid steps exist for large
    batches (v7x has two TensorCores sharing the grid)."""
    row_bytes = max(1, n_input * itemsize)
    per_buf_cap = max(_MIB, vmem_cap // 6)      # room for 3 h bufs + out + W
    target = min(4 * _MIB, per_buf_cap)
    tile = max(128, _round_down(target // row_bytes, 128))
    if batch > tile:
        floor = max(128, _round_down(_MIB // row_bytes, 128))
        four_way = max(128, _round_down(batch // 4, 128))
        tile = min(tile, max(four_way, floor))
    return tile


def _buffered_block_spec(block_shape, index_map, n_buf):
    """h-stream BlockSpec with n_buf-deep pipelining (falls back gracefully)."""
    try:
        return pl.BlockSpec(block_shape, index_map,
                            pipeline_mode=pl.Buffered(n_buf))
    except Exception:                      # older jax: default double-buffering
        return pl.BlockSpec(block_shape, index_map)


# ---------------------------------------------------------------------------
# Forward wrapper
# ---------------------------------------------------------------------------

def critic_network_forward(h_t, weight, bias, *, tile_rows=None):
    """Forward pass of critic_network: v_t = h_t @ weight.T + bias.

    h_t:    (B, n_input)          f32 or bf16 (bf16 halves HBM traffic)
    weight: (n_output, n_input)   PyTorch nn.Linear layout
    bias:   (n_output,)
    returns (B, n_output) in h_t.dtype
    """
    B, n_input = h_t.shape
    n_output, n_input_w = weight.shape
    assert n_input_w == n_input, "weight/input feature mismatch"

    itemsize = jnp.dtype(h_t.dtype).itemsize
    vmem_cap = _vmem_capacity_bytes()
    if tile_rows is None:
        tile_rows = _choose_tile_rows(B, n_input, itemsize, vmem_cap)
    else:
        tile_rows = max(128, _round_down(int(tile_rows), 128))

    w_cast = weight.astype(h_t.dtype)      # tiny one-time cast; bf16 h -> bf16 MXU
    scalar_head = (n_output == 1)

    if scalar_head:
        kernel = _value_head_kernel
        w_arg = w_cast                                       # (1, n_input)
        b_arg = bias.astype(jnp.float32)                     # (1,) SMEM scalar
        b_space = pltpu.MemorySpace.SMEM
        out_shape = jax.ShapeDtypeStruct((1, B), h_t.dtype)  # lane-dense row
    else:
        kernel = _linear_kernel
        w_arg = w_cast.T                                     # (n_input, n_output)
        b_arg = bias.astype(jnp.float32).reshape(1, n_output)
        b_space = pltpu.MemorySpace.VMEM
        out_shape = jax.ShapeDtypeStruct((B, n_output), h_t.dtype)

    w_bytes = int(w_arg.size) * w_arg.dtype.itemsize
    h_bytes = B * n_input * itemsize

    if B <= tile_rows:
        # Whole problem fits one byte-budgeted tile: grid-less call, no
        # per-step grid bookkeeping at all.
        needed = h_bytes + B * n_output * itemsize + w_bytes + 2 * _MIB
        vmem_limit = int(min(max(needed, 32 * _MIB), vmem_cap))
        out = pl.pallas_call(
            kernel,
            out_shape=out_shape,
            in_specs=[
                pl.BlockSpec(memory_space=pltpu.MemorySpace.VMEM),   # h_t
                pl.BlockSpec(memory_space=pltpu.MemorySpace.VMEM),   # weight
                pl.BlockSpec(memory_space=b_space),                  # bias
            ],
            out_specs=pl.BlockSpec(memory_space=pltpu.MemorySpace.VMEM),
            compiler_params=pltpu.CompilerParams(vmem_limit_bytes=vmem_limit),
        )(h_t, w_arg, b_arg)
        return out.reshape(B, n_output) if scalar_head else out

    # Tiled rollout-batch path: stream h through byte-sized, multi-buffered
    # (tile_rows, n_input) blocks; weight/bias stay resident; batch axis is
    # "parallel" so both v7x TensorCores share this mem-bound op.
    grid = (pl.cdiv(B, tile_rows),)
    h_tile_bytes = tile_rows * n_input * itemsize
    n_buf = 3 if (3 * h_tile_bytes + 4 * _MIB) <= (vmem_cap * 3) // 4 else 2
    needed = (n_buf * h_tile_bytes
              + 2 * tile_rows * n_output * itemsize
              + 2 * w_bytes + 2 * _MIB)
    vmem_limit = int(min(max(needed, 32 * _MIB), vmem_cap))

    h_spec = _buffered_block_spec((tile_rows, n_input), lambda i: (i, 0), n_buf)
    w_spec = pl.BlockSpec(tuple(w_arg.shape), lambda i: (0, 0))
    if scalar_head:
        b_spec = pl.BlockSpec(memory_space=pltpu.MemorySpace.SMEM)
        o_spec = pl.BlockSpec((1, tile_rows), lambda i: (0, i))       # lane-dense
    else:
        b_spec = pl.BlockSpec((1, n_output), lambda i: (0, 0))
        o_spec = pl.BlockSpec((tile_rows, n_output), lambda i: (i, 0))

    out = pl.pallas_call(
        kernel,
        out_shape=out_shape,
        grid_spec=pl.GridSpec(
            grid=grid,
            in_specs=[h_spec, w_spec, b_spec],
            out_specs=o_spec,
        ),
        compiler_params=pltpu.CompilerParams(
            dimension_semantics=("parallel",),
            vmem_limit_bytes=vmem_limit),
    )(h_t, w_arg, b_arg)
    return out.reshape(B, n_output) if scalar_head else out


# ---------------------------------------------------------------------------
# Reference + smoke tests
# ---------------------------------------------------------------------------

def _reference(h_t, weight, bias):
    return jnp.dot(h_t, weight.T, precision=jax.lax.Precision.HIGHEST) + bias[None, :]


if __name__ == "__main__":
    key = jax.random.PRNGKey(0)
    k_h, k_w, k_b, k_h2, k_w2, k_b2 = jax.random.split(key, 6)
    # Tolerances are loose enough to tolerate an MXU bf16 pass on either side;
    # real bugs (wrong block index, missing bias, transposed operand) show up
    # as O(0.1..1) errors.
    TOL = dict(atol=2e-3, rtol=2e-3)

    # 1) Module-sized example: B=8 states, n_input=32 hidden, scalar value head.
    B, n_input, n_output = 8, 32, 1
    h_t = jax.random.normal(k_h, (B, n_input), dtype=jnp.float32)
    bound = 1.0 / jnp.sqrt(jnp.float32(n_input))
    weight = jax.random.uniform(k_w, (n_output, n_input), jnp.float32, -bound, bound)
    bias = jax.random.uniform(k_b, (n_output,), jnp.float32, -bound, bound)

    v_t = jax.block_until_ready(critic_network_forward(h_t, weight, bias))
    assert v_t.shape == (B, n_output)
    assert jnp.allclose(v_t, _reference(h_t, weight, bias), **TOL), "mismatch (small head)"

    # 2) Tiled rollout-batch path (tile_rows forced small so the grid,
    #    multi-buffering, lane-dense out_spec and VMEM budgeting are all
    #    exercised at small total size: grid of 4 steps).
    B2, n_in2 = 512, 128
    h2 = jax.random.normal(k_h2, (B2, n_in2), dtype=jnp.float32)
    bound2 = 1.0 / jnp.sqrt(jnp.float32(n_in2))
    w2 = jax.random.uniform(k_w2, (1, n_in2), jnp.float32, -bound2, bound2)
    b2 = jax.random.uniform(k_b2, (1,), jnp.float32, -bound2, bound2)
    v2 = jax.block_until_ready(critic_network_forward(h2, w2, b2, tile_rows=128))
    assert v2.shape == (B2, 1)
    assert jnp.allclose(v2, _reference(h2, w2, b2), **TOL), "mismatch (tiled head)"

    # 3) General n_output > 1 path, grid-less and tiled.
    n_out3 = 8
    w3 = jax.random.uniform(k_w2, (n_out3, n_in2), jnp.float32, -bound2, bound2)
    b3 = jax.random.uniform(k_b2, (n_out3,), jnp.float32, -bound2, bound2)
    v3 = jax.block_until_ready(critic_network_forward(h2, w3, b3))
    v3t = jax.block_until_ready(critic_network_forward(h2, w3, b3, tile_rows=128))
    assert v3.shape == (B2, n_out3) and v3t.shape == (B2, n_out3)
    assert jnp.allclose(v3, _reference(h2, w3, b3), **TOL), "mismatch (general)"
    assert jnp.allclose(v3t, _reference(h2, w3, b3), **TOL), "mismatch (general tiled)"

    print("KERNEL_OK")
</pallas_src>

<mosaic_0001>
module attributes {stable_mosaic.version = 11 : i64} {
  func.func @_value_head_kernel(%arg0: memref<8x32xf32, #tpu.memory_space<vmem>>, %arg1: memref<1x32xf32, #tpu.memory_space<vmem>>, %arg2: memref<1xf32, #tpu.memory_space<smem>>, %arg3: memref<1x8xf32, #tpu.memory_space<vmem>>) attributes {dimension_semantics = [], scalar_prefetch = 0 : i64, scratch_operands = 0 : i64, tpu.core_type = #tpu.core_type<tc>} {
    %c0 = arith.constant 0 : index
    %c0_0 = arith.constant 0 : index
    %0 = vector.load %arg1[%c0, %c0_0] : memref<1x32xf32, #tpu.memory_space<vmem>>, vector<1x32xf32>
    %c0_1 = arith.constant 0 : index
    %c0_2 = arith.constant 0 : index
    %1 = vector.load %arg0[%c0_1, %c0_2] : memref<8x32xf32, #tpu.memory_space<vmem>>, vector<8x32xf32>
    %cst = arith.constant dense<0.000000e+00> : vector<1x8xf32>
    %2 = tpu.matmul %0, %1, %cst {dimension_numbers = #tpu.dot_dimension_numbers<[1], [1], [0], [0], [0, 0, 1, 0], [], []>} : vector<1x32xf32>, vector<8x32xf32>, vector<1x8xf32> -> vector<1x8xf32>
    %c0_3 = arith.constant 0 : index
    %3 = memref.load %arg2[%c0_3] : memref<1xf32, #tpu.memory_space<smem>>
    %4 = vector.broadcast %3 : f32 to vector<1x8xf32>
    %5 = arith.addf %2, %4 : vector<1x8xf32>
    %c0_4 = arith.constant 0 : index
    %c0_5 = arith.constant 0 : index
    %6 = vector.load %arg3[%c0_4, %c0_5] : memref<1x8xf32, #tpu.memory_space<vmem>>, vector<1x8xf32>
    tpu.vector_store %arg3[%c0_4, %c0_5], %5 {strides = array<i32>} : memref<1x8xf32, #tpu.memory_space<vmem>>, vector<1x8xf32>,
    return
  }
}

</mosaic_0001>

<bundles_post_ra>
// kernel: tpu_custom_call.1
= control target key start
LH: loop header
LB: loop body
LE: loop exit
PB: predicated region body
PF: predicated region fallthrough
CT: control target
= control target key end

     0   :  { %9 = vsyncpa [#allocation4], 0  ;;  %s241_s0 = inlined_call_operand.hbm [shape: f32[8,32], index: 0, kind: input, shape index: {}]   ;;  %s242_s1 = inlined_call_operand.vmem [shape: f32[1,32], index: 1, kind: input, shape index: {}]   ;;  %s243_s2 = inlined_call_operand.<no memory space> [shape: f32[1], index: 2, kind: input, shape index: {}]   ;;  %s244_s3 = inlined_call_operand.hbm [shape: f32[1,8], index: 3, kind: output, shape index: {}]  }
   0x1   :  { %10 = vsyncpa [#allocation5], 0  ;;  %s187_s12 = smov [#allocation3]   ;;  %s139_s16 = scalar_lea.hbm %s241_s0, 128 }
   0x2   :  { %s17_s13 = sshll.u32 %s187_s12, 4  ;;  %p140_p0 = scmp.ne.s32.totalorder %s241_s0, %s139_s16  ;;  %s18_s13 = int_to_ptr.vmem [resolvable:$true] %s17_s13 }
   0x3   :  { %p143_p1 = scmp.lt.u32.totalorder %s139_s16, %s241_s0 }
   0x5   :  { %p145_p2 = pnand %p143_p1, %p140_p0 }
   0x7   :  { %148 = shalt.err (!%p145_p2)
}
   0x8   :  { %s149_s21 = scalar_lea.vmem %s18_s13, 128  ;;  %p154_p4 = scmp.lt.s32.totalorder %s18_s13, %s18_s13 }
   0x9   :  { %p150_p3 = scmp.ne.s32.totalorder %s18_s13, %s149_s21  ;;  %p155_p5 = scmp.lt.s32.totalorder %s149_s21, %s149_s21 }
   0xb   :  { %p156_p6 = por %p155_p5, %p154_p4 }
   0xd   :  { %p157_p7 = pnand %p156_p6, %p150_p3 }
   0xf   :  { %160 = shalt.err (!%p157_p7)
}
  0x10   :  { %20 = dma.hbm_to_vmem [thread:$0]  %s241_s0, 128, %s18_s13, [#allocation4]  }
  0x11   :  { %183 = dma.done.wait [#allocation4], 128  }
  0x12   :  { %184 = vsyncadd [#allocation4], 4294967168  ;;  %v188_v0 = vmov 0.0   ;;  %vm189_vm0 = vmmov 0   ;;  %vm32_vm1 = vcmask 261120   ;;  %v29_v1 = vld [vmem:[#allocation3] sm:$0xff]  ;;  %v31_v3 = vstv %s243_s2 }
  0x13   :  { %130 = vmatprep.subr.mxu0 %v188_v0  ;;  %132 = vmatprep.mubr.msk.f32.mxu0 %vm189_vm0, %v188_v0  ;;  %v28_v2 = vld [vmem:[%s242_s1] sm:$0x1]  ;;  %s190_s28 = smov [#allocation6]   ;;  %vm109_vm2 = vcmask 57344  }
  0x14   :  { %131 = vmatpush3.xpose.msk.msra.mxu0 %vm32_vm1, %v29_v1  ;;  %s117_s0 = sshll.u32 %s190_s28, 4  ;;  %s118_s0 = int_to_ptr.vmem [resolvable:$true] %s117_s0 }
  0x15   :  { %s161_s29 = scalar_lea.vmem %s118_s0, 16  ;;  %s165_s30 = scalar_lea.vmem %s118_s0, 32 }
  0x16   :  { %p162_p8 = scmp.ne.s32.totalorder %s118_s0, %s161_s29  ;;  %p166_p9 = scmp.lt.s32.totalorder %s118_s0, %s118_s0 }
  0x17   :  { %133 = vmatmul.mubr.msk.f32.vlgmr.msra.gmra.mrb[0].mxu0 %vm32_vm1, %v28_v2  ;;  %p167_p10 = scmp.lt.s32.totalorder %s165_s30, %s161_s29 }
  0x19   :  { %p168_p11 = por %p167_p10, %p166_p9 }
  0x1b   :  { %p169_p12 = pnand %p168_p11, %p162_p8 }
  0xea   :  { %v105_v4 = vpop.f32.mrb[0].mxu0 }
  0xeb   :  { %v106_v5 = vadd.f32 %v105_v4, %v31_v3  ;;  %v134_v6 = vpop.f32.mrb[1].mxu0 }
  0xed   :  { %110 = vst.msk [vmem:[#allocation6] sm:$0x1] %vm109_vm2, %v106_v5 }
  0xee   :  { %172 = shalt.err (!%p169_p12)
}
  0xef   :  { %s173_s2 = scalar_lea.hbm %s244_s3, 16 }
  0xf0   :  { %p174_p13 = scmp.ne.s32.totalorder %s244_s3, %s173_s2  ;;  %p177_p0 = scmp.lt.u32.totalorder %s173_s2, %s244_s3 }
  0xf2   :  { %p179_p1 = pnand %p177_p0, %p174_p13 }
  0xf4   :  { %182 = shalt.err (!%p179_p1)
}
  0xf5   :  { %120 = dma.vmem_to_hbm [thread:$0]  %s118_s0, 16, %s244_s3, [#allocation5]  }
  0xf6   :  { %185 = dma.done.wait [#allocation5], 16  }
  0xf7   :  { %186 = vsyncadd [#allocation5], 4294967280 }
  0xf8   :  { %124 = vsyncpa [#allocation4], 1 }
  0xf9   :  { %125 = vsyncpa [#allocation5], 1 }

</bundles_post_ra>
